<compile_context>
chip_gen: v6e
topology: v6e:2x2x1
jax: 0.10.0
libtpu: 0.0.40
codegen_flags: <defaults>
</compile_context>

<pallas_src>
import jax
import jax.numpy as jnp
from jax.experimental import pallas as pl
from jax.experimental.pallas import tpu as pltpu

EPS = 1e-6


def _vmem_limit_bytes() -> int:
    """~80% of physical VMEM (≈102 MiB on v5e/v6e, ≈51 MiB on v7x); safe fallback."""
    try:
        info = pltpu.get_tpu_info()
        cap = getattr(info, "vmem_capacity_bytes", None)
        if cap:
            return int(cap * 0.8)
    except Exception:
        pass
    return 64 * 1024 * 1024  # interpret / non-TPU fallback (ignored there anyway)


def _norm(v, alpha, bias, d):
    # torch Norm: alpha * (v - mean) / (std_unbiased + eps) + bias   (exact math)
    mean = jnp.mean(v, axis=-1, keepdims=True)
    diff = v - mean
    std = jnp.sqrt(jnp.sum(diff * diff, axis=-1, keepdims=True) / (d - 1))
    return alpha * (diff / (std + EPS)) + bias


# --------------------------- kernel 1: Norm1 + K/V ---------------------------
def _make_kv_kernel(heads, d_model, matmul_dtype):
    dk = d_model // heads

    def kernel(x_ref, n1a_ref, n1b_ref, wkv_ref, bkv_ref, k_ref, v_ref):
        x = x_ref[0]                                              # (TR, D) f32
        x2 = _norm(x, n1a_ref[...], n1b_ref[...], d_model).astype(matmul_dtype)
        # One wide MXU contraction for fused [K|V].
        kv = jnp.dot(x2, wkv_ref[...],
                     preferred_element_type=jnp.float32) + bkv_ref[...]  # (TR, 2D)
        # Write head-major K/V directly (static, dk-aligned lane slices).
        for h in range(heads):
            k_ref[0, h] = kv[:, h * dk:(h + 1) * dk].astype(k_ref.dtype)
            v_ref[0, h] = kv[:, d_model + h * dk:d_model + (h + 1) * dk].astype(v_ref.dtype)

    return kernel


# ---------------- kernel 2: Q proj + attention + Wo + Norm2 + FF -------------
def _make_attn_ff_kernel(heads, d_model, matmul_dtype):
    dk = d_model // heads
    scale = 1.0 / float(dk) ** 0.5

    def kernel(x_ref, k_ref, v_ref, maskb_ref,
               n1a_ref, n1b_ref, wq_ref, bq_ref, wo_ref, bo_ref,
               n2a_ref, n2b_ref, w1_ref, b1_ref, w2_ref, b2_ref,
               out_ref):
        xq = x_ref[0]                                             # (TQ, D) f32 residual tile
        mask_bias = maskb_ref[0]                                  # (1, S): 0 keep / -1e9 masked

        # Recompute Norm1 on the local tile (cheap, row-wise) so the Q
        # projection never round-trips through HBM. 1/sqrt(dk) folded into Q.
        x2 = _norm(xq, n1a_ref[...], n1b_ref[...], d_model).astype(matmul_dtype)
        q_all = (jnp.dot(x2, wq_ref[...], preferred_element_type=jnp.float32)
                 + bq_ref[...]) * scale                           # (TQ, D) f32

        # Per-head attention with accumulating output projection:
        #   concat(heads) @ Wo == sum_h head_h @ Wo[h]
        # Live set: one (TQ, S) score tile + one (TQ, D) f32 accumulator.
        acc = jnp.zeros((xq.shape[0], d_model), jnp.float32)
        for h in range(heads):
            q_h = q_all[:, h * dk:(h + 1) * dk].astype(matmul_dtype)   # (TQ, dk)
            k_h = k_ref[0, h]                                          # (S, dk)
            v_h = v_ref[0, h]                                          # (S, dk)

            s = jnp.einsum("qd,kd->qk", q_h, k_h,
                           preferred_element_type=jnp.float32) + mask_bias  # (TQ, S)
            # NOTE: additive -1e9 bias matches the reference for any row with at
            # least one unmasked key (true here); fully-masked rows would differ.
            s = s - jnp.max(s, axis=-1, keepdims=True)
            p = jnp.exp(s)
            p = p / jnp.sum(p, axis=-1, keepdims=True)            # exact (correctness)

            ctx = jnp.dot(p.astype(matmul_dtype), v_h,
                          preferred_element_type=jnp.float32)     # (TQ, dk)
            acc = acc + jnp.dot(ctx.astype(matmul_dtype), wo_ref[h],
                                preferred_element_type=jnp.float32)  # (TQ, D)

        x = xq + acc + bo_ref[...]                                # dropout_1 = identity (eval)

        # Sublayer 2: Norm2 + FeedForward + residual.
        x2b = _norm(x, n2a_ref[...], n2b_ref[...], d_model).astype(matmul_dtype)
        h1 = jnp.dot(x2b, w1_ref[...], preferred_element_type=jnp.float32) + b1_ref[...]
        h1 = jnp.maximum(h1, 0.0).astype(matmul_dtype)
        ff = jnp.dot(h1, w2_ref[...], preferred_element_type=jnp.float32) + b2_ref[...]

        out_ref[0] = (x + ff).astype(out_ref.dtype)               # dropout_2 = identity (eval)

    return kernel


# --------------------------------- wrapper -----------------------------------
def encoder_layer(x, mask, params, heads, *,
                  matmul_dtype=jnp.bfloat16, row_tile=256, q_tile=256):
    """x: (B,S,D) f32, mask: (B,1,S) f32 (1 = attend, 0 = masked)."""
    B, S, D = x.shape
    assert D % heads == 0
    dk = D // heads
    d_ff = params["w1"].shape[1]
    mm = matmul_dtype

    row_tile = min(row_tile, S)
    q_tile = min(q_tile, S)
    assert S % row_tile == 0 and S % q_tile == 0

    vmem_limit = _vmem_limit_bytes()

    # Cast MXU weight operands once (bf16 halves weight HBM<->VMEM bytes).
    wkv = jnp.concatenate([params["wk"], params["wv"]], axis=1).astype(mm)   # (D, 2D)
    bkv = jnp.concatenate([params["bk"], params["bv"]], axis=1)              # (1, 2D) f32
    wq = params["wq"].astype(mm)
    w1 = params["w1"].astype(mm)
    w2 = params["w2"].astype(mm)
    wo_r = params["wo"].reshape(heads, dk, D).astype(mm)                     # per-head Wo

    # Additive mask bias precomputed once: 0 where attend, -1e9 where masked.
    mask_bias = (mask.astype(jnp.float32) - 1.0) * 1e9

    const = lambda shape: pl.BlockSpec(shape, lambda b, i, _s=shape: (0,) * len(_s))

    # ---- kernel 1: Norm1 + fused K/V projection, head-major output ----------
    kv_call = pl.pallas_call(
        _make_kv_kernel(heads, D, mm),
        out_shape=(jax.ShapeDtypeStruct((B, heads, S, dk), mm),) * 2,
        grid_spec=pltpu.PrefetchScalarGridSpec(
            num_scalar_prefetch=0,
            grid=(B, S // row_tile),
            in_specs=[
                pl.BlockSpec((1, row_tile, D), lambda b, r: (b, r, 0)),   # x tile
                const((1, D)), const((1, D)),                             # norm1 a, b
                const((D, 2 * D)), const((1, 2 * D)),                     # Wkv, bkv
            ],
            out_specs=[pl.BlockSpec((1, heads, row_tile, dk),
                                    lambda b, r: (b, 0, r, 0))] * 2,
        ),
        compiler_params=pltpu.CompilerParams(
            dimension_semantics=("parallel", "parallel"),
            vmem_limit_bytes=vmem_limit),
    )
    kh, vh = kv_call(x, params["n1a"], params["n1b"], wkv, bkv)

    # ---- kernel 2: Q proj + attention + Wo + Norm2 + FF + residuals ---------
    attn_call = pl.pallas_call(
        _make_attn_ff_kernel(heads, D, mm),
        out_shape=jax.ShapeDtypeStruct((B, S, D), jnp.float32),
        grid_spec=pltpu.PrefetchScalarGridSpec(
            num_scalar_prefetch=0,
            grid=(B, S // q_tile),   # B outermost: dual-TC split lands on batch
            in_specs=[
                pl.BlockSpec((1, q_tile, D), lambda b, i: (b, i, 0)),          # x tile
                pl.BlockSpec((1, heads, S, dk), lambda b, i: (b, 0, 0, 0)),    # K (revisited per b)
                pl.BlockSpec((1, heads, S, dk), lambda b, i: (b, 0, 0, 0)),    # V (revisited per b)
                pl.BlockSpec((1, 1, S), lambda b, i: (b, 0, 0)),               # mask bias
                const((1, D)), const((1, D)),                                  # norm1 a, b
                const((D, D)), const((1, D)),                                  # Wq, bq
                const((heads, dk, D)), const((1, D)),                          # Wo (per-head), bo
                const((1, D)), const((1, D)),                                  # norm2 a, b
                const((D, d_ff)), const((1, d_ff)),                            # W1, b1
                const((d_ff, D)), const((1, D)),                               # W2, b2
            ],
            out_specs=pl.BlockSpec((1, q_tile, D), lambda b, i: (b, i, 0)),
        ),
        compiler_params=pltpu.CompilerParams(
            dimension_semantics=("parallel", "parallel"),
            vmem_limit_bytes=vmem_limit),
    )
    return attn_call(x, kh, vh, mask_bias,
                     params["n1a"], params["n1b"], wq, params["bq"],
                     wo_r, params["bo"],
                     params["n2a"], params["n2b"],
                     w1, params["b1"], w2, params["b2"])


# ------------------------------ pure-JAX reference ---------------------------
def encoder_layer_ref(x, mask, params, heads):
    B, S, D = x.shape
    dk = D // heads

    def norm(v, a, b):
        mean = jnp.mean(v, axis=-1, keepdims=True)
        diff = v - mean
        std = jnp.sqrt(jnp.sum(diff * diff, axis=-1, keepdims=True) / (D - 1))
        return a * diff / (std + EPS) + b

    x2 = norm(x, params["n1a"], params["n1b"])
    q = x2 @ params["wq"] + params["bq"]
    k = x2 @ params["wk"] + params["bk"]
    v = x2 @ params["wv"] + params["bv"]
    q = q.reshape(B, S, heads, dk).transpose(0, 2, 1, 3)
    k = k.reshape(B, S, heads, dk).transpose(0, 2, 1, 3)
    v = v.reshape(B, S, heads, dk).transpose(0, 2, 1, 3)
    scores = jnp.einsum("bhqd,bhkd->bhqk", q, k) / jnp.sqrt(jnp.float32(dk))
    scores = jnp.where(mask[:, None, :, :] == 0, -1e9, scores)
    p = jax.nn.softmax(scores, axis=-1)
    o = jnp.einsum("bhqk,bhkd->bhqd", p, v).transpose(0, 2, 1, 3).reshape(B, S, D)
    x = x + (o @ params["wo"] + params["bo"])
    x2 = norm(x, params["n2a"], params["n2b"])
    ff = jnp.maximum(x2 @ params["w1"] + params["b1"], 0.0) @ params["w2"] + params["b2"]
    return x + ff


if __name__ == "__main__":
    # Lane-dense small demo: dk = D/heads = 128, D and d_ff multiples of 128.
    B, S, D, HEADS = 2, 32, 256, 2
    D_FF = 512  # TODO(synk): PyTorch FeedForward default is d_ff=2048; shrunk for a small demo.

    key = jax.random.PRNGKey(0)
    ks = jax.random.split(key, 16)
    init = lambda k, shape: 0.05 * jax.random.normal(k, shape, jnp.float32)

    # Linear weights stored as (in, out) == W.T of torch's (out, in) layout.
    params = {
        "n1a": jnp.ones((1, D), jnp.float32),  "n1b": jnp.zeros((1, D), jnp.float32),
        "n2a": jnp.ones((1, D), jnp.float32),  "n2b": jnp.zeros((1, D), jnp.float32),
        "wq": init(ks[0], (D, D)), "bq": init(ks[1], (1, D)),
        "wk": init(ks[2], (D, D)), "bk": init(ks[3], (1, D)),
        "wv": init(ks[4], (D, D)), "bv": init(ks[5], (1, D)),
        "wo": init(ks[6], (D, D)), "bo": init(ks[7], (1, D)),
        "w1": init(ks[8], (D, D_FF)), "b1": init(ks[9], (1, D_FF)),
        "w2": init(ks[10], (D_FF, D)), "b2": init(ks[11], (1, D)),
    }

    x = jax.random.normal(ks[12], (B, S, D), jnp.float32)
    # mask: first sequence fully valid, second has the last 7 positions padded out.
    lengths = jnp.array([S, S - 7])
    mask = (jnp.arange(S)[None, None, :] < lengths[:, None, None]).astype(jnp.float32)

    ref = encoder_layer_ref(x, mask, params, HEADS)

    # f32 MXU operands: bit-faithful path (exact norm / softmax math in-kernel).
    out_f32 = jax.block_until_ready(
        encoder_layer(x, mask, params, HEADS, matmul_dtype=jnp.float32))
    assert out_f32.shape == (B, S, D)
    assert jnp.allclose(out_f32, ref, atol=5e-3, rtol=5e-3), "f32 kernel mismatch"

    # Default bf16 MXU operands with f32 accumulation (perf path); loose
    # tolerance only reflects bf16 operand rounding (typical max err ~1e-2..3e-2).
    out_bf16 = jax.block_until_ready(encoder_layer(x, mask, params, HEADS))
    assert out_bf16.shape == (B, S, D)
    assert jnp.allclose(out_bf16, ref, atol=1e-1, rtol=1e-1), "bf16 kernel mismatch"

    print("KERNEL_OK")
</pallas_src>

<mosaic_0001>
module attributes {stable_mosaic.version = 11 : i64} {
  func.func @kernel(%arg0: i32, %arg1: i32, %arg2: memref<1x32x256xf32, #tpu.memory_space<vmem>>, %arg3: memref<1x256xf32, #tpu.memory_space<vmem>>, %arg4: memref<1x256xf32, #tpu.memory_space<vmem>>, %arg5: memref<256x512xf32, #tpu.memory_space<vmem>>, %arg6: memref<1x512xf32, #tpu.memory_space<vmem>>, %arg7: memref<1x2x32x128xf32, #tpu.memory_space<vmem>>, %arg8: memref<1x2x32x128xf32, #tpu.memory_space<vmem>>) attributes {dimension_semantics = [#tpu.dimension_semantics<parallel>, #tpu.dimension_semantics<parallel>], iteration_bounds = array<i64: 2, 1>, scalar_prefetch = 0 : i64, scratch_operands = 0 : i64, tpu.core_type = #tpu.core_type<tc>, window_params = [{transform_indices = @transform_0, window_bounds = array<i64: 1, 32, 256>}, {pipeline_mode = #tpu.pipeline_mode<synchronous>, transform_indices = @transform_1, window_bounds = array<i64: 1, 256>}, {pipeline_mode = #tpu.pipeline_mode<synchronous>, transform_indices = @transform_2, window_bounds = array<i64: 1, 256>}, {pipeline_mode = #tpu.pipeline_mode<synchronous>, transform_indices = @transform_3, window_bounds = array<i64: 256, 512>}, {pipeline_mode = #tpu.pipeline_mode<synchronous>, transform_indices = @transform_4, window_bounds = array<i64: 1, 512>}, {transform_indices = @transform_5, window_bounds = array<i64: 1, 2, 32, 128>}, {transform_indices = @transform_6, window_bounds = array<i64: 1, 2, 32, 128>}]} {
    %c0 = arith.constant 0 : index
    %c0_0 = arith.constant 0 : index
    %c0_1 = arith.constant 0 : index
    %0 = vector.load %arg2[%c0, %c0_0, %c0_1] : memref<1x32x256xf32, #tpu.memory_space<vmem>>, vector<1x32x256xf32>
    %1 = vector.shape_cast %0 : vector<1x32x256xf32> to vector<32x256xf32>
    %c0_2 = arith.constant 0 : index
    %c0_3 = arith.constant 0 : index
    %2 = vector.load %arg3[%c0_2, %c0_3] : memref<1x256xf32, #tpu.memory_space<vmem>>, vector<1x256xf32>
    %c0_4 = arith.constant 0 : index
    %c0_5 = arith.constant 0 : index
    %3 = vector.load %arg4[%c0_4, %c0_5] : memref<1x256xf32, #tpu.memory_space<vmem>>, vector<1x256xf32>
    %cst = arith.constant dense<0.000000e+00> : vector<32xf32>
    %4 = vector.multi_reduction <add>, %1, %cst [1] : vector<32x256xf32> to vector<32xf32>
    %5 = vector.shape_cast %4 : vector<32xf32> to vector<32x1xf32>
    %cst_6 = arith.constant 2.560000e+02 : f32
    %6 = vector.broadcast %cst_6 : f32 to vector<32x1xf32>
    %7 = arith.divf %5, %6 : vector<32x1xf32>
    %8 = vector.broadcast %7 : vector<32x1xf32> to vector<32x256xf32>
    %9 = arith.subf %1, %8 : vector<32x256xf32>
    %10 = arith.mulf %9, %9 : vector<32x256xf32>
    %cst_7 = arith.constant dense<0.000000e+00> : vector<32xf32>
    %11 = vector.multi_reduction <add>, %10, %cst_7 [1] : vector<32x256xf32> to vector<32xf32>
    %12 = vector.shape_cast %11 : vector<32xf32> to vector<32x1xf32>
    %cst_8 = arith.constant 2.550000e+02 : f32
    %13 = vector.broadcast %cst_8 : f32 to vector<32x1xf32>
    %14 = arith.divf %12, %13 : vector<32x1xf32>
    %15 = math.sqrt %14 : vector<32x1xf32>
    %cst_9 = arith.constant 9.99999997E-7 : f32
    %16 = vector.broadcast %cst_9 : f32 to vector<32x1xf32>
    %17 = arith.addf %15, %16 : vector<32x1xf32>
    %18 = vector.broadcast %17 : vector<32x1xf32> to vector<32x256xf32>
    %19 = arith.divf %9, %18 : vector<32x256xf32>
    %20 = vector.broadcast %2 : vector<1x256xf32> to vector<32x256xf32>
    %21 = arith.mulf %20, %19 : vector<32x256xf32>
    %22 = vector.broadcast %3 : vector<1x256xf32> to vector<32x256xf32>
    %23 = arith.addf %21, %22 : vector<32x256xf32>
    %c0_10 = arith.constant 0 : index
    %c0_11 = arith.constant 0 : index
    %24 = vector.load %arg5[%c0_10, %c0_11] : memref<256x512xf32, #tpu.memory_space<vmem>>, vector<256x512xf32>
    %cst_12 = arith.constant dense<0.000000e+00> : vector<32x512xf32>
    %25 = tpu.matmul %23, %24, %cst_12 {dimension_numbers = #tpu.dot_dimension_numbers<[1], [0], [0], [1], [0, 0, 1, 1], [], []>} : vector<32x256xf32>, vector<256x512xf32>, vector<32x512xf32> -> vector<32x512xf32>
    %c0_13 = arith.constant 0 : index
    %c0_14 = arith.constant 0 : index
    %26 = vector.load %arg6[%c0_13, %c0_14] : memref<1x512xf32, #tpu.memory_space<vmem>>, vector<1x512xf32>
    %27 = vector.broadcast %26 : vector<1x512xf32> to vector<32x512xf32>
    %28 = arith.addf %25, %27 : vector<32x512xf32>
    %29 = vector.extract_strided_slice %28 {offsets = [0, 0], sizes = [32, 128], strides = [1, 1]} : vector<32x512xf32> to vector<32x128xf32>
    %c0_15 = arith.constant 0 : index
    %c0_16 = arith.constant 0 : index
    %c0_17 = arith.constant 0 : index
    %c0_18 = arith.constant 0 : index
    %30 = vector.load %arg7[%c0_15, %c0_16, %c0_17, %c0_18] : memref<1x2x32x128xf32, #tpu.memory_space<vmem>>, vector<1x1x32x128xf32>
    %31 = vector.shape_cast %30 : vector<1x1x32x128xf32> to vector<32x128xf32>
    %32 = vector.shape_cast %29 : vector<32x128xf32> to vector<1x1x32x128xf32>
    tpu.vector_store %arg7[%c0_15, %c0_16, %c0_17, %c0_18], %32 {strides = array<i32>} : memref<1x2x32x128xf32, #tpu.memory_space<vmem>>, vector<1x1x32x128xf32>,
    %33 = vector.extract_strided_slice %28 {offsets = [0, 256], sizes = [32, 128], strides = [1, 1]} : vector<32x512xf32> to vector<32x128xf32>
    %c0_19 = arith.constant 0 : index
    %c0_20 = arith.constant 0 : index
    %c0_21 = arith.constant 0 : index
    %c0_22 = arith.constant 0 : index
    %34 = vector.load %arg8[%c0_19, %c0_20, %c0_21, %c0_22] : memref<1x2x32x128xf32, #tpu.memory_space<vmem>>, vector<1x1x32x128xf32>
    %35 = vector.shape_cast %34 : vector<1x1x32x128xf32> to vector<32x128xf32>
    %36 = vector.shape_cast %33 : vector<32x128xf32> to vector<1x1x32x128xf32>
    tpu.vector_store %arg8[%c0_19, %c0_20, %c0_21, %c0_22], %36 {strides = array<i32>} : memref<1x2x32x128xf32, #tpu.memory_space<vmem>>, vector<1x1x32x128xf32>,
    %37 = vector.extract_strided_slice %28 {offsets = [0, 128], sizes = [32, 128], strides = [1, 1]} : vector<32x512xf32> to vector<32x128xf32>
    %c0_23 = arith.constant 0 : index
    %c1 = arith.constant 1 : index
    %c0_24 = arith.constant 0 : index
    %c0_25 = arith.constant 0 : index
    %38 = vector.load %arg7[%c0_23, %c1, %c0_24, %c0_25] : memref<1x2x32x128xf32, #tpu.memory_space<vmem>>, vector<1x1x32x128xf32>
    %39 = vector.shape_cast %38 : vector<1x1x32x128xf32> to vector<32x128xf32>
    %40 = vector.shape_cast %37 : vector<32x128xf32> to vector<1x1x32x128xf32>
    tpu.vector_store %arg7[%c0_23, %c1, %c0_24, %c0_25], %40 {strides = array<i32>} : memref<1x2x32x128xf32, #tpu.memory_space<vmem>>, vector<1x1x32x128xf32>,
    %41 = vector.extract_strided_slice %28 {offsets = [0, 384], sizes = [32, 128], strides = [1, 1]} : vector<32x512xf32> to vector<32x128xf32>
    %c0_26 = arith.constant 0 : index
    %c1_27 = arith.constant 1 : index
    %c0_28 = arith.constant 0 : index
    %c0_29 = arith.constant 0 : index
    %42 = vector.load %arg8[%c0_26, %c1_27, %c0_28, %c0_29] : memref<1x2x32x128xf32, #tpu.memory_space<vmem>>, vector<1x1x32x128xf32>
    %43 = vector.shape_cast %42 : vector<1x1x32x128xf32> to vector<32x128xf32>
    %44 = vector.shape_cast %41 : vector<32x128xf32> to vector<1x1x32x128xf32>
    tpu.vector_store %arg8[%c0_26, %c1_27, %c0_28, %c0_29], %44 {strides = array<i32>} : memref<1x2x32x128xf32, #tpu.memory_space<vmem>>, vector<1x1x32x128xf32>,
    return
  }
  func.func @transform_0(%arg0: i32, %arg1: i32) -> (i32, i32, i32) {
    %c0_i32 = arith.constant 0 : i32
    %c0_i32_0 = arith.constant 0 : i32
    return %arg0, %arg1, %c0_i32 : i32, i32, i32
  }
  func.func @transform_1(%arg0: i32, %arg1: i32) -> (i32, i32) {
    %c0_i32 = arith.constant 0 : i32
    %c0_i32_0 = arith.constant 0 : i32
    %c0_i32_1 = arith.constant 0 : i32
    return %c0_i32, %c0_i32_0 : i32, i32
  }
  func.func @transform_2(%arg0: i32, %arg1: i32) -> (i32, i32) {
    %c0_i32 = arith.constant 0 : i32
    %c0_i32_0 = arith.constant 0 : i32
    %c0_i32_1 = arith.constant 0 : i32
    return %c0_i32, %c0_i32_0 : i32, i32
  }
  func.func @transform_3(%arg0: i32, %arg1: i32) -> (i32, i32) {
    %c0_i32 = arith.constant 0 : i32
    %c0_i32_0 = arith.constant 0 : i32
    %c0_i32_1 = arith.constant 0 : i32
    return %c0_i32, %c0_i32_0 : i32, i32
  }
  func.func @transform_4(%arg0: i32, %arg1: i32) -> (i32, i32) {
    %c0_i32 = arith.constant 0 : i32
    %c0_i32_0 = arith.constant 0 : i32
    %c0_i32_1 = arith.constant 0 : i32
    return %c0_i32, %c0_i32_0 : i32, i32
  }
  func.func @transform_5(%arg0: i32, %arg1: i32) -> (i32, i32, i32, i32) {
    %c0_i32 = arith.constant 0 : i32
    %c0_i32_0 = arith.constant 0 : i32
    %c0_i32_1 = arith.constant 0 : i32
    return %arg0, %c0_i32, %arg1, %c0_i32_0 : i32, i32, i32, i32
  }
  func.func @transform_6(%arg0: i32, %arg1: i32) -> (i32, i32, i32, i32) {
    %c0_i32 = arith.constant 0 : i32
    %c0_i32_0 = arith.constant 0 : i32
    %c0_i32_1 = arith.constant 0 : i32
    return %arg0, %c0_i32, %arg1, %c0_i32_0 : i32, i32, i32, i32
  }
}

</mosaic_0001>

<bundles_post_ra>
// kernel: tpu_custom_call.1
= control target key start
LH: loop header
LB: loop body
LE: loop exit
PB: predicated region body
PF: predicated region fallthrough
CT: control target
= control target key end

     0   :  { %s1725_s0 = inlined_call_operand.hbm [shape: f32[2,32,256], index: 0, kind: input, shape index: {}]   ;;  %s1726_s1 = inlined_call_operand.hbm [shape: f32[1,256], index: 1, kind: input, shape index: {}]   ;;  %s1727_s2 = inlined_call_operand.vmem [shape: f32[1,256], index: 2, kind: input, shape index: {}]   ;;  %s1728_s3 = inlined_call_operand.hbm [shape: f32[256,512], index: 3, kind: input, shape index: {}]   ;;  %s1729_s4 = inlined_call_operand.vmem [shape: f32[1,512], index: 4, kind: input, shape index: {}]   ;;  %s1730_s5 = inlined_call_operand.hbm [shape: f32[2,2,32,128], index: 5, kind: output, shape index: {0}]   ;;  %s1731_s6 = inlined_call_operand.hbm [shape: f32[2,2,32,128], index: 6, kind: output, shape index: {1}]  }
   0x1   :  { %1742 = sst [smem:[#allocation18_spill]] %s1726_s1 }
   0x2   :  { %12 = vsyncpa [#allocation3], 0 }
   0x3   :  { %14 = vsyncpa [#allocation3 + $0x1], 0 }
   0x4   :  { %15 = vsyncpa [#allocation6], 0 }
   0x5   :  { %16 = vsyncpa [#allocation4], 0 }
   0x6   :  { %18 = vsyncpa [#allocation4 + $0x1], 0 }
   0x7   :  { %19 = vsyncpa [#allocation10], 0 }
   0x8   :  { %21 = vsyncpa [#allocation10 + $0x1], 0  ;;  %s1386_s21 = smov 0   ;;  %s1388_s22 = smov 0  }
   0x9   :  { %s1390_s23 = smov 0   ;;  %s1392_s24 = smov 0  }
   0xa   :  { %s1394_s25 = smov 0   ;;  %s1396_s26 = smov 0  }
   0xb LB: > { %1743 = sst [smem:[#allocation15_spill]] %s1318_s21  ;;  %s1000_s27 = sadd.s32 4294967295, %s1338_s26   ;;  %s1338_s26 = sphi %s1396_s26, %s27_s26   ;;  %s1334_s25 = sphi %s1394_s25, %s1771_s25   ;;  %s1330_s24 = sphi %s1392_s24, %s1770_s24   ;;  %s1326_s23 = sphi %s1390_s23, %s1769_s23   ;;  %s1322_s22 = sphi %s1388_s22, %s1768_s22   ;;  %s1318_s21 = sphi %s1386_s21, %s1767_s21  }
   0xc   : > { %1744 = sst [smem:[#allocation16_spill]] %s1338_s26  ;;  %s1001_s28 = sadd.s32 4294967294, %s1338_s26  }
   0xd   : > { %p55_p0 = scmp.ne.s32.totalorder %s1326_s23, %s1322_s22  ;;  %p56_p1 = scmp.eq.s32.totalorder %s1338_s26, 0 }
   0xe   : > { %p61_p2 = scmp.ne.s32.totalorder %s1322_s22, %s1318_s21  ;;  %p1424_p3 = scmp.eq.s32.totalorder %s1000_s27, 0 }
   0xf   : > { %p171_p4 = scmp.eq.s32.totalorder %s1000_s27, 1  ;;  %p1428_p5 = por %p56_p1, %p55_p0 }
  0x10   : > { %s1745_s30 = scalar_select %p1424_p3, 1, 0 }
  0x11   : > { %p177_p6 = scmp.eq.s32.totalorder %s1001_s28, 1  ;;  %p1434_p7 = por %p1424_p3, %p61_p2 }
  0x12   : > { %p1438_p8 = por %p171_p4, %p55_p0  ;;  %p1002_p10 = scmp.ge.s32.totalorder %s1338_s26, 1 }
  0x13   : > { %s1747_s8 = scalar_select %p1434_p7, 1, 0 }
  0x14   : > { %s1748_s9 = scalar_select %p1438_p8, 1, 0 }
  0x15   : > { %p1442_p9 = por %p177_p6, %p61_p2  ;;  %p212_p11 = scmp.lt.s32.totalorder %s1338_s26, 3 }
  0x16   : > { %s1340_s12 = smov [#allocation5]   ;;  %p1068_p1 = scmp.lt.s32.totalorder %s1338_s26, 2 }
  0x17   : > { %s1749_s10 = scalar_select %p1442_p9, 1, 0 }
  0x18   : > { %p1449_p13 = pnand %p1002_p10, %p212_p11  ;;  %s225_s13 = sshll.u32 %s1340_s12, 4  ;;  %s226_s13 = int_to_ptr.vmem [resolvable:$true] %s225_s13 }
  0x19   : > { %1750 = sst [smem:[#allocation17_spill]] %s1749_s10  ;;  %p1458_p4 = pnand %p1068_p1, %p1428_p5 }
  0x1a   : > { %s1751_s11 = scalar_select %p1449_p13, 1, 0 }
  0x1b   : > { %p1048_p0 = pneg %p1449_p13  ;;  %s1341_s15 = smov [#allocation7]  }
  0x1c   : > { %s1752_s14 = scalar_select %p1458_p4, 1, 0 }
  0x1d   : > { %s238_s16 = sshll.u32 %s1341_s15, 4  ;;  %p1464_p2 = pnand %p1048_p0, %p1424_p3  ;;  %s239_s16 = int_to_ptr.vmem [resolvable:$true] %s238_s16 }
  0x1e   : > { %s1155_s18 = scalar_lea.vmem %s226_s13, 32  ;;  %p1163_p1 = scmp.lt.s32.totalorder %s226_s13, %s226_s13 }
  0x1f   : > { %p1146_p6 = pneg %p1464_p2  ;;  %p1156_p10 = scmp.ne.s32.totalorder %s226_s13, %s1155_s18 }
  0x20   : > { %p1164_p12 = scmp.lt.s32.totalorder %s1155_s18, %s1155_s18 }
  0x21   : > { %p1158_p5 = pnand %p1156_p10, %p1146_p6 }
  0x22   : > { %p1165_p9 = por %p1164_p12, %p1163_p1 }
  0x23   : > { %p1159_p11 = pneg %p1158_p5 }
  0x25   : > { %p1166_p8 = pnand %p1165_p9, %p1159_p11 }
  0x27   : > { %1169 = shalt.err (!%p1166_p8)
}
  0x28   : > { %s1754_s1 = sld [smem:[#allocation18_spill]]  ;;  %s1181_s27 = scalar_lea.vmem %s239_s16, 16384 }
  0x29   : > { %p1182_p0 = scmp.ne.s32.totalorder %s239_s16, %s1181_s27  ;;  %p1189_p10 = scmp.lt.s32.totalorder %s239_s16, %s239_s16 }
  0x2a   : > { %p1190_p5 = scmp.lt.s32.totalorder %s1181_s27, %s1181_s27 }
  0x2b   : > { %p1184_p3 = pnand %p1182_p0, %p1146_p6 }
  0x2c   : > { %p1191_p13 = por %p1190_p5, %p1189_p10 }
  0x2d   : > { %p1185_p7 = pneg %p1184_p3 }
  0x2e   : > { %1051 = dma.hbm_to_vmem [thread:$0]  (!%p1464_p2), %s1754_s1, 32, %s226_s13, [#allocation6]  }
  0x2f   : > { %p1192_p4 = pnand %p1191_p13, %p1185_p7 }
  0x31   : > { %1195 = shalt.err (!%p1192_p4)
}
  0x32   : > { %s1342_s28 = smov 512   ;;  %s1343_s7 = smov 32  }
  0x33   : > { %1054 = dma.hbm_to_vmem [thread:$0]  (!%p1464_p2), %s1728_s3, 16384, %s239_s16, [#allocation6], %s1342_s28, %s1342_s28, %s1343_s7  }
  0x34   : > { %s255_s15 = sand.u32 1, %s1326_s23   ;;  %s39_s18 = sadd.s32 1, %s1334_s25 }
  0x35   : > { %s1006_s19 = sshll.u32 %s255_s15, 6  ;;  %p41_p3 = scmp.ge.s32.totalorder %s39_s18, 2 }
  0x36   : > { %s1031_s20 = sshll.u32 %s1334_s25, 10  ;;  %s259_s27 = scalar_lea.vmem [#allocation2], %s1006_s19 }
  0x37   : > { %s269_s29 = sshll.u32 %s259_s27, 4  ;;  %s1773_s18 = smov (%p41_p3, %s39_s18), 0  ;;  %s270_s29 = int_to_ptr.vmem [resolvable:$true] %s269_s29 }
  0x38   : > { %s268_s10 = scalar_lea.hbm %s1725_s0, %s1031_s20  ;;  %s43_s17 = ssub.s32 %s1334_s25, %s1773_s18 }
  0x39   : > { %p1496_p7 = scmp.eq.s32.totalorder %s43_s17, 0  ;;  %s256_s16 = scalar_lea.sflag [#allocation3], %s255_s15 }
  0x3a   : > { %p1756_p8 = scmp.ne.s32.totalorder %s1752_s14, 0  ;;  %s1209_s28 = scalar_lea.vmem %s270_s29, 1024 }
  0x3b   : > { %p1210_p12 = scmp.ne.s32.totalorder %s270_s29, %s1209_s28  ;;  %s1344_s7 = smov [#allocation2]  }
  0x3c   : > { %p1198_p9 = pneg %p1756_p8  ;;  %s1214_s12 = sshll.u32 %s1344_s7, 4  ;;  %s1215_s12 = int_to_ptr.vmem [resolvable:$false] %s1214_s12 }
  0x3d   : > { %s1216_s13 = scalar_lea.vmem %s1215_s12, 2048  ;;  %p1217_p2 = scmp.lt.s32.totalorder %s270_s29, %s1215_s12 }
  0x3e   : > { %p1212_p13 = pnand %p1210_p12, %p1198_p9  ;;  %p1218_p6 = scmp.lt.s32.totalorder %s1216_s13, %s1209_s28 }
  0x40   : > { %p1213_p4 = pneg %p1212_p13  ;;  %p1219_p11 = por %p1218_p6, %p1217_p2 }
  0x42   : > { %p1220_p1 = pnand %p1219_p11, %p1213_p4 }
  0x44   : > { %1223 = shalt.err (!%p1220_p1)
}
  0x45   : > { %s1345_s1 = smov 256   ;;  %s1346_s26 = smov 16  }
  0x46   : > { %1058 = dma.hbm_to_vmem [thread:$0]  (!%p1756_p8), %s268_s10, 1024, %s270_s29, %s256_s16, %s1345_s1, %s1345_s1, %s1346_s26  }
  0x47   : > { %s1757_s15 = sadd.s32 1, %s1326_s23  ;;  %p1758_p0 = scmp.ne.s32.totalorder %s1751_s11, 0 }
  0x48   : > { %s1509_s19 = scalar_select %p1496_p7, %s1326_s23, %s1757_s15  }
  0x49   : > { %281 = sbr.rel (%p1758_p0) target bundleno = 657 (0x291), region = 40  ;;  %s1514_s20 = sand.u32 (!%p1758_p0), 1, %s1322_s22  }
  0x4a   : > { %s1517_s27 = sshll.u32 (!%p1758_p0), %s1514_s20, 6  ;;  %s284_s17 = scalar_lea.sflag (!%p1758_p0), [#allocation3], %s1514_s20 }
  0x4b   : > { %s287_s28 = scalar_lea.vmem (!%p1758_p0), [#allocation2], %s1517_s27  ;;  %p1759_p10 = scmp.ne.s32.totalorder (!%p1758_p0), %s1747_s8, 0 }
  0x4e   : > { %1301 = dma.done.wait (%p1759_p10), %s284_s17, 1024  }
  0x4f   : > { %1303 = vsyncadd (%p1759_p10), %s284_s17, 4294966272  ;;  %p1760_p5 = scmp.ne.s32.totalorder %s1745_s30, 0 }
  0x51   : > { %1305 = dma.done.wait (%p1760_p5), [#allocation6], 16416  }
  0x52   : > { %1307 = vsyncadd (%p1760_p5), [#allocation6], 4294950880  ;;  %v1529_v0 = vld [vmem:[%s287_s28] sm:$0xff]  ;;  %v1531_v1 = vld [vmem:[%s287_s28 + $0x8] sm:$0xff]  ;;  %s1614_s10 = scalar_lea.vmem [#allocation8], %s1517_s27  ;;  %s1618_s11 = scalar_lea.vmem [#allocation9], %s1517_s27 }
  0x53   : > { %v1533_v2 = vld [vmem:[%s287_s28 + $0x20] sm:$0xff]  ;;  %v342_v3 = vadd.f32 %v1531_v1, %v1529_v0  ;;  %v1537_v4 = vld [vmem:[%s287_s28 + $0x28] sm:$0xff]  ;;  %v1539_v5 = vld [vmem:[%s287_s28 + $0x10] sm:$0xff]  ;;  %s841_s14 = sshll.u32 %s1614_s10, 4  ;;  %s859_s16 = sshll.u32 %s1618_s11, 4  ;;  %s1632_s14 = int_to_ptr.vmem [resolvable:$true] %s841_s14  ;;  %s1634_s16 = int_to_ptr.vmem [resolvable:$true] %s859_s16 }
  0x54   : > { %v1541_v6 = vld [vmem:[%s287_s28 + $0x18] sm:$0xff]  ;;  %v348_v7 = vadd.f32 %v1537_v4, %v1533_v2  ;;  %v1545_v8 = vld [vmem:[%s287_s28 + $0x30] sm:$0xff]  ;;  %v534_v14 = vld [vmem:[#allocation7 + $0x1e0] sm:$0xff]  ;;  %s1032_s7 = sshll.u32 %s1330_s24, 10  ;;  %s821_s27 = scalar_lea.sflag [#allocation4], %s1514_s20 }
  0x55   : > { %v1547_v9 = vld [vmem:[%s287_s28 + $0x38] sm:$0xff]  ;;  %343 = vadd.xlane.f32.xlu0 %v342_v3  ;;  %v345_v10 = vadd.f32 %v1541_v6, %v1539_v5  ;;  %v535_v12 = vld [vmem:[#allocation7 + $0x1e8] sm:$0xff]  ;;  %v530_v18 = vld [vmem:[#allocation7 + $0x1c0] sm:$0xff]  ;;  %s1641_s13 = scalar_lea.hbm %s1730_s5, %s1032_s7  ;;  %s1648_s15 = scalar_lea.hbm %s1731_s6, %s1032_s7 }
  0x56   : > { %349 = vadd.xlane.f32.xlu1 %v348_v7  ;;  %v351_v11 = vadd.f32 %v1547_v9, %v1545_v8  ;;  %v537_v13 = vld [vmem:[#allocation7 + $0x1f8] sm:$0xff]  ;;  %624 = vmatprep.subr.mxu0 %v535_v12  ;;  %v536_v15 = vld [vmem:[#allocation7 + $0x1f0] sm:$0xff]  ;;  %v531_v16 = vld [vmem:[#allocation7 + $0x1c8] sm:$0xff]  ;;  %s1224_s17 = scalar_lea.vmem %s1632_s14, 1024  ;;  %p1761_p7 = scmp.ne.s32.totalorder %s1748_s9, 0 }
  0x57   : > { %713 = vmatprep.subr.mxu1 %v537_v13  ;;  %v533_v17 = vld [vmem:[#allocation7 + $0x1d8] sm:$0xff]  ;;  %625 = vmatpush1.msra.mxu0 %v534_v14  ;;  %v532_v19 = vld [vmem:[#allocation7 + $0x1d0] sm:$0xff]  ;;  %v527_v20 = vld [vmem:[#allocation7 + $0x1a8] sm:$0xff]  ;;  %p1225_p3 = scmp.ne.s32.totalorder %s1632_s14, %s1224_s17  ;;  %s1347_s28 = smov [#allocation8]  }
  0x58   : > { %714 = vmatpush1.msra.mxu1 %v536_v15  ;;  %626 = vmatprep.subr.mxu0 %v531_v16  ;;  %v529_v21 = vld [vmem:[#allocation7 + $0x1b8] sm:$0xff]  ;;  %v526_v22 = vld [vmem:[#allocation7 + $0x1a0] sm:$0xff]  ;;  %v528_v23 = vld [vmem:[#allocation7 + $0x1b0] sm:$0xff]  ;;  %s1228_s21 = sshll.u32 %s1347_s28, 4  ;;  %s1229_s21 = int_to_ptr.vmem [resolvable:$false] %s1228_s21 }
  0x59   : > { %346 = vadd.xlane.f32.xlu0 %v345_v10  ;;  %715 = vmatprep.subr.mxu1 %v533_v17  ;;  %v523_v24 = vld [vmem:[#allocation7 + $0x188] sm:$0xff]  ;;  %v525_v25 = vld [vmem:[#allocation7 + $0x198] sm:$0xff]  ;;  %v522_v26 = vld [vmem:[#allocation7 + $0x180] sm:$0xff]  ;;  %p1226_p8 = pnand %p1225_p3, %p1761_p7  ;;  %s1230_s29 = scalar_lea.vmem %s1229_s21, 2048 }
  0x5a   : > { %352 = vadd.xlane.f32.xlu1 %v351_v11  ;;  %627 = vmatpush1.msra.mxu0 %v530_v18  ;;  %v524_v27 = vld [vmem:[#allocation7 + $0x190] sm:$0xff]  ;;  %v519_v28 = vld [vmem:[#allocation7 + $0x168] sm:$0xff]  ;;  %v521_v29 = vld [vmem:[#allocation7 + $0x178] sm:$0xff]  ;;  %p1231_p12 = scmp.lt.s32.totalorder %s1632_s14, %s1229_s21  ;;  %p1232_p13 = scmp.lt.s32.totalorder %s1230_s29, %s1224_s17 }
  0x5b   : > { %716 = vmatpush1.msra.mxu1 %v532_v19  ;;  %628 = vmatprep.subr.mxu0 %v527_v20  ;;  %v518_v30 = vld [vmem:[#allocation7 + $0x160] sm:$0xff]  ;;  %v520_v31 = vld [vmem:[#allocation7 + $0x170] sm:$0xff]  ;;  %v515_v32 = vld [vmem:[#allocation7 + $0x148] sm:$0xff]  ;;  %p1227_p9 = pneg %p1226_p8 }
  0x5c   : > { %717 = vmatprep.subr.mxu1 %v529_v21  ;;  %629 = vmatpush1.msra.mxu0 %v526_v22  ;;  %v517_v33 = vld [vmem:[#allocation7 + $0x158] sm:$0xff]  ;;  %v514_v34 = vld [vmem:[#allocation7 + $0x140] sm:$0xff]  ;;  %v516_v35 = vld [vmem:[#allocation7 + $0x150] sm:$0xff]  ;;  %p1233_p4 = por %p1232_p13, %p1231_p12 }
  0x5d   : > { %718 = vmatpush1.msra.mxu1 %v528_v23  ;;  %630 = vmatprep.subr.mxu0 %v523_v24  ;;  %v511_v36 = vld [vmem:[#allocation7 + $0x128] sm:$0xff]  ;;  %v513_v37 = vld [vmem:[#allocation7 + $0x138] sm:$0xff]  ;;  %v510_v38 = vld [vmem:[#allocation7 + $0x120] sm:$0xff] }
  0x5e   : > { %719 = vmatprep.subr.mxu1 %v525_v25  ;;  %631 = vmatpush1.msra.mxu0 %v522_v26  ;;  %v512_v39 = vld [vmem:[#allocation7 + $0x130] sm:$0xff]  ;;  %v507_v40 = vld [vmem:[#allocation7 + $0x108] sm:$0xff]  ;;  %v509_v41 = vld [vmem:[#allocation7 + $0x118] sm:$0xff]  ;;  %p1234_p2 = pnand %p1233_p4, %p1227_p9 }
  0x5f   : > { %720 = vmatpush1.msra.mxu1 %v524_v27  ;;  %632 = vmatprep.subr.mxu0 %v519_v28  ;;  %v506_v42 = vld [vmem:[#allocation7 + $0x100] sm:$0xff]  ;;  %v508_v43 = vld [vmem:[#allocation7 + $0x110] sm:$0xff]  ;;  %v503_v44 = vld [vmem:[#allocation7 + $0xe8] sm:$0xff] }
  0x60   : > { %721 = vmatprep.subr.mxu1 %v521_v29  ;;  %633 = vmatpush1.msra.mxu0 %v518_v30  ;;  %v505_v45 = vld [vmem:[#allocation7 + $0xf8] sm:$0xff]  ;;  %v502_v46 = vld [vmem:[#allocation7 + $0xe0] sm:$0xff]  ;;  %v504_v47 = vld [vmem:[#allocation7 + $0xf0] sm:$0xff] }
  0x61   : > { %722 = vmatpush1.msra.mxu1 %v520_v31  ;;  %634 = vmatprep.subr.mxu0 %v515_v32  ;;  %v499_v48 = vld [vmem:[#allocation7 + $0xc8] sm:$0xff]  ;;  %v501_v49 = vld [vmem:[#allocation7 + $0xd8] sm:$0xff]  ;;  %v498_v50 = vld [vmem:[#allocation7 + $0xc0] sm:$0xff] }
  0x62   : > { %723 = vmatprep.subr.mxu1 %v517_v33  ;;  %635 = vmatpush1.msra.mxu0 %v514_v34  ;;  %v500_v51 = vld [vmem:[#allocation7 + $0xd0] sm:$0xff]  ;;  %v495_v52 = vld [vmem:[#allocation7 + $0xa8] sm:$0xff]  ;;  %v497_v53 = vld [vmem:[#allocation7 + $0xb8] sm:$0xff] }
  0x63   : > { %724 = vmatpush1.msra.mxu1 %v516_v35  ;;  %636 = vmatprep.subr.mxu0 %v511_v36  ;;  %v496_v19 = vld [vmem:[#allocation7 + $0xb0] sm:$0xff]  ;;  %v491_v20 = vld [vmem:[#allocation7 + $0x88] sm:$0xff]  ;;  %v493_v21 = vld [vmem:[#allocation7 + $0x98] sm:$0xff] }
  0x64   : > { %725 = vmatprep.subr.mxu1 %v513_v37  ;;  %637 = vmatpush1.msra.mxu0 %v510_v38  ;;  %v490_v22 = vld [vmem:[#allocation7 + $0x80] sm:$0xff]  ;;  %v492_v23 = vld [vmem:[#allocation7 + $0x90] sm:$0xff]  ;;  %v487_v24 = vld [vmem:[#allocation7 + $0x68] sm:$0xff] }
  0x65   : > { %726 = vmatpush1.msra.mxu1 %v512_v39  ;;  %638 = vmatprep.subr.mxu0 %v507_v40  ;;  %v489_v25 = vld [vmem:[#allocation7 + $0x78] sm:$0xff]  ;;  %v486_v26 = vld [vmem:[#allocation7 + $0x60] sm:$0xff]  ;;  %v488_v27 = vld [vmem:[#allocation7 + $0x70] sm:$0xff] }
  0x66   : > { %727 = vmatprep.subr.mxu1 %v509_v41  ;;  %639 = vmatpush1.msra.mxu0 %v506_v42  ;;  %v483_v28 = vld [vmem:[#allocation7 + $0x48] sm:$0xff]  ;;  %v485_v29 = vld [vmem:[#allocation7 + $0x58] sm:$0xff]  ;;  %v482_v30 = vld [vmem:[#allocation7 + $0x40] sm:$0xff] }
  0x67   : > { %728 = vmatpush1.msra.mxu1 %v508_v43  ;;  %640 = vmatprep.subr.mxu0 %v503_v44  ;;  %v484_v31 = vld [vmem:[#allocation7 + $0x50] sm:$0xff]  ;;  %v479_v32 = vld [vmem:[#allocation7 + $0x28] sm:$0xff]  ;;  %v481_v33 = vld [vmem:[#allocation7 + $0x38] sm:$0xff] }
  0x68   : > { %729 = vmatprep.subr.mxu1 %v505_v45  ;;  %641 = vmatpush1.msra.mxu0 %v502_v46  ;;  %v478_v34 = vld [vmem:[#allocation7 + $0x20] sm:$0xff]  ;;  %v480_v35 = vld [vmem:[#allocation7 + $0x30] sm:$0xff]  ;;  %v475_v36 = vld [vmem:[#allocation7 + $0x8] sm:$0xff] }
  0x69   : > { %730 = vmatpush1.msra.mxu1 %v504_v47  ;;  %642 = vmatprep.subr.mxu0 %v499_v48  ;;  %v477_v37 = vld [vmem:[#allocation7 + $0x18] sm:$0xff]  ;;  %v474_v38 = vld [vmem:[#allocation7] sm:$0xff]  ;;  %v476_v39 = vld [vmem:[#allocation7 + $0x10] sm:$0xff] }
  0x6a   : > { %731 = vmatprep.subr.mxu1 %v501_v49  ;;  %643 = vmatpush1.msra.mxu0 %v498_v50  ;;  %v599_v40 = vld [vmem:[#allocation7 + $0x3e8] sm:$0xff]  ;;  %v601_v41 = vld [vmem:[#allocation7 + $0x3f8] sm:$0xff]  ;;  %v598_v42 = vld [vmem:[#allocation7 + $0x3e0] sm:$0xff] }
  0x6b   : > { %732 = vmatpush1.msra.mxu1 %v500_v51  ;;  %644 = vmatprep.subr.mxu0 %v495_v52  ;;  %v600_v43 = vld [vmem:[#allocation7 + $0x3f0] sm:$0xff]  ;;  %v595_v44 = vld [vmem:[#allocation7 + $0x3c8] sm:$0xff]  ;;  %v597_v45 = vld [vmem:[#allocation7 + $0x3d8] sm:$0xff] }
  0x6c   : > { %733 = vmatprep.subr.mxu1 %v497_v53  ;;  %v594_v46 = vld [vmem:[#allocation7 + $0x3c0] sm:$0xff]  ;;  %v596_v47 = vld [vmem:[#allocation7 + $0x3d0] sm:$0xff]  ;;  %v591_v48 = vld [vmem:[#allocation7 + $0x3a8] sm:$0xff] }
  0x6d   : > { %734 = vmatpush1.msra.mxu1 %v496_v19  ;;  %v593_v49 = vld [vmem:[#allocation7 + $0x3b8] sm:$0xff]  ;;  %v590_v50 = vld [vmem:[#allocation7 + $0x3a0] sm:$0xff]  ;;  %v592_v51 = vld [vmem:[#allocation7 + $0x3b0] sm:$0xff] }
  0x6e   : > { %735 = vmatprep.subr.mxu1 %v493_v21  ;;  %v587_v52 = vld [vmem:[#allocation7 + $0x388] sm:$0xff]  ;;  %v589_v53 = vld [vmem:[#allocation7 + $0x398] sm:$0xff]  ;;  %v568_v19 = vld [vmem:[#allocation7 + $0x2f0] sm:$0xff] }
  0x6f   : > { %736 = vmatpush1.msra.mxu1 %v492_v23  ;;  %v565_v21 = vld [vmem:[#allocation7 + $0x2d8] sm:$0xff]  ;;  %v564_v23 = vld [vmem:[#allocation7 + $0x2d0] sm:$0xff] }
  0x70   : > { %737 = vmatprep.subr.mxu1 %v489_v25  ;;  %v561_v25 = vld [vmem:[#allocation7 + $0x2b8] sm:$0xff] }
  0x71   : > { %738 = vmatpush1.msra.mxu1 %v488_v27  ;;  %v560_v27 = vld [vmem:[#allocation7 + $0x2b0] sm:$0xff] }
  0x72   : > { %739 = vmatprep.subr.mxu1 %v485_v29  ;;  %v557_v29 = vld [vmem:[#allocation7 + $0x298] sm:$0xff] }
  0x73   : > { %740 = vmatpush1.msra.mxu1 %v484_v31  ;;  %v556_v31 = vld [vmem:[#allocation7 + $0x290] sm:$0xff] }
  0x74   : > { %741 = vmatprep.subr.mxu1 %v481_v33  ;;  %v553_v33 = vld [vmem:[#allocation7 + $0x278] sm:$0xff] }
  0x75   : > { %742 = vmatpush1.msra.mxu1 %v480_v35  ;;  %v552_v35 = vld [vmem:[#allocation7 + $0x270] sm:$0xff] }
  0x76   : > { %743 = vmatprep.subr.mxu1 %v477_v37  ;;  %v549_v37 = vld [vmem:[#allocation7 + $0x258] sm:$0xff] }
  0x77   : > { %744 = vmatpush1.msra.mxu1 %v476_v39  ;;  %v548_v39 = vld [vmem:[#allocation7 + $0x250] sm:$0xff] }
  0x78   : > { %745 = vmatprep.subr.mxu1 %v601_v41  ;;  %v545_v41 = vld [vmem:[#allocation7 + $0x238] sm:$0xff] }
  0x79   : > { %746 = vmatpush2.msra.mxu1 %v600_v43  ;;  %v544_v43 = vld [vmem:[#allocation7 + $0x230] sm:$0xff] }
  0x7a   : > { %747 = vmatprep.subr.mxu1 %v597_v45  ;;  %v541_v45 = vld [vmem:[#allocation7 + $0x218] sm:$0xff] }
  0x7b   : > { %748 = vmatpush2.msra.mxu1 %v596_v47  ;;  %v540_v47 = vld [vmem:[#allocation7 + $0x210] sm:$0xff] }
  0x7c   : > { %749 = vmatprep.subr.mxu1 %v593_v49 }
  0x7d   : > { %750 = vmatpush2.msra.mxu1 %v592_v51 }
  0x7e   : > { %751 = vmatprep.subr.mxu1 %v589_v53 }
  0xde   : > { %v344_v54 = vpop.xlane.xlu0 %343 }
  0xdf   : > { %v355_v55 = vmul.f32 0.00390625, %v344_v54  ;;  %v350_v56 = vpop.xlane.xlu1 %349  ;;  %v586_v54 = vld [vmem:[#allocation7 + $0x380] sm:$0xff] }
  0xe0   : > { %v357_v57 = vmul.f32 0.00390625, %v350_v56  ;;  %v583_v56 = vld [vmem:[#allocation7 + $0x368] sm:$0xff] }
  0xe1   : > { %v1554_v58 = vsub.f32 %v1529_v0, %v355_v55  ;;  %v1557_v59 = vsub.f32 %v1531_v1, %v355_v55  ;;  %v588_v55 = vld [vmem:[#allocation7 + $0x390] sm:$0xff] }
  0xe2   : > { %v1560_v60 = vsub.f32 %v1533_v2, %v357_v57  ;;  %v1563_v61 = vsub.f32 %v1537_v4, %v357_v57  ;;  %v347_v62 = vpop.xlane.xlu0 %346  ;;  %752 = vmatpush2.msra.mxu1 %v588_v55  ;;  %v585_v57 = vld [vmem:[#allocation7 + $0x378] sm:$0xff] }
  0xe3   : > { %v356_v63 = vmul.f32 0.00390625, %v347_v62  ;;  %v353_v3 = vpop.xlane.xlu1 %352  ;;  %v367_v7 = vmul.f32 %v1554_v58, %v1554_v58  ;;  %v368_v10 = vmul.f32 %v1557_v59, %v1557_v59  ;;  %753 = vmatprep.subr.mxu1 %v585_v57  ;;  %v582_v62 = vld [vmem:[#allocation7 + $0x360] sm:$0xff] }
  0xe4   : > { %v358_v0 = vmul.f32 0.00390625, %v353_v3  ;;  %v371_v1 = vmul.f32 %v1560_v60, %v1560_v60  ;;  %v372_v2 = vmul.f32 %v1563_v61, %v1563_v61  ;;  %v579_v3 = vld [vmem:[#allocation7 + $0x348] sm:$0xff] }
  0xe5   : > { %v1574_v11 = vsub.f32 %v1539_v5, %v356_v63  ;;  %v1577_v4 = vsub.f32 %v1541_v6, %v356_v63  ;;  %v375_v12 = vadd.f32 %v368_v10, %v367_v7  ;;  %v584_v63 = vld [vmem:[#allocation7 + $0x370] sm:$0xff]  ;;  %v581_v7 = vld [vmem:[#allocation7 + $0x358] sm:$0xff]  ;;  %v578_v10 = vld [vmem:[#allocation7 + $0x340] sm:$0xff] }
  0xe6   : > { %v1580_v13 = vsub.f32 %v1545_v8, %v358_v0  ;;  %v1583_v14 = vsub.f32 %v1547_v9, %v358_v0  ;;  %v381_v15 = vadd.f32 %v372_v2, %v371_v1  ;;  %v494_v9 = vld [vmem:[#allocation7 + $0xa0] sm:$0xff]  ;;  %754 = vmatpush2.msra.mxu1 %v584_v63  ;;  %v580_v0 = vld [vmem:[#allocation7 + $0x350] sm:$0xff]  ;;  %v575_v1 = vld [vmem:[#allocation7 + $0x328] sm:$0xff] }
  0xe7   : > { %376 = vadd.xlane.f32.xlu0 %v375_v12  ;;  %v369_v16 = vmul.f32 %v1574_v11, %v1574_v11  ;;  %v370_v17 = vmul.f32 %v1577_v4, %v1577_v4  ;;  %645 = vmatpush1.msra.mxu0 %v494_v9  ;;  %v577_v2 = vld [vmem:[#allocation7 + $0x338] sm:$0xff]  ;;  %v574_v12 = vld [vmem:[#allocation7 + $0x320] sm:$0xff] }
  0xe8   : > { %v373_v5 = vmul.f32 %v1580_v13, %v1580_v13  ;;  %v374_v6 = vmul.f32 %v1583_v14, %v1583_v14  ;;  %646 = vmatprep.subr.mxu0 %v491_v20  ;;  %755 = vmatprep.subr.mxu1 %v581_v7  ;;  %v566_v9 = vld [vmem:[#allocation7 + $0x2e0] sm:$0xff]  ;;  %v563_v20 = vld [vmem:[#allocation7 + $0x2c8] sm:$0xff] }
  0xe9   : > { %v378_v18 = vadd.f32 %v370_v17, %v369_v16  ;;  %647 = vmatpush1.msra.mxu0 %v490_v22  ;;  %756 = vmatpush2.msra.mxu1 %v580_v0  ;;  %v571_v16 = vld [vmem:[#allocation7 + $0x308] sm:$0xff]  ;;  %v573_v17 = vld [vmem:[#allocation7 + $0x318] sm:$0xff]  ;;  %v562_v22 = vld [vmem:[#allocation7 + $0x2c0] sm:$0xff] }
  0xea   : > { %v384_v8 = vadd.f32 %v374_v6, %v373_v5  ;;  %648 = vmatprep.subr.mxu0 %v487_v24  ;;  %757 = vmatprep.subr.mxu1 %v577_v2  ;;  %v570_v5 = vld [vmem:[#allocation7 + $0x300] sm:$0xff]  ;;  %v572_v6 = vld [vmem:[#allocation7 + $0x310] sm:$0xff]  ;;  %v559_v24 = vld [vmem:[#allocation7 + $0x2a8] sm:$0xff]  ;;  %v437_v2 = vlaneseq }
  0xeb   : > { %382 = vadd.xlane.f32.xlu0 %v381_v15  ;;  %379 = vadd.xlane.f32.xlu1 %v378_v18  ;;  %v576_v15 = vld [vmem:[#allocation7 + $0x330] sm:$0xff]  ;;  %v567_v18 = vld [vmem:[#allocation7 + $0x2e8] sm:$0xff] }
  0xec   : > { %649 = vmatpush1.msra.mxu0 %v486_v26  ;;  %758 = vmatpush2.msra.mxu1 %v576_v15  ;;  %v558_v26 = vld [vmem:[#allocation7 + $0x2a0] sm:$0xff] }
  0xed   : > { %650 = vmatprep.subr.mxu0 %v483_v28  ;;  %759 = vmatprep.subr.mxu1 %v573_v17  ;;  %v555_v28 = vld [vmem:[#allocation7 + $0x288] sm:$0xff] }
  0xee   : > { %651 = vmatpush1.msra.mxu0 %v482_v30  ;;  %760 = vmatpush2.msra.mxu1 %v572_v6  ;;  %v554_v30 = vld [vmem:[#allocation7 + $0x280] sm:$0xff] }
  0xef   : > { %385 = vadd.xlane.f32.xlu1 %v384_v8  ;;  %652 = vmatprep.subr.mxu0 %v479_v32  ;;  %v569_v8 = vld [vmem:[#allocation7 + $0x2f8] sm:$0xff]  ;;  %v551_v32 = vld [vmem:[#allocation7 + $0x268] sm:$0xff] }
  0xf0   : > { %653 = vmatpush1.msra.mxu0 %v478_v34  ;;  %761 = vmatprep.subr.mxu1 %v569_v8  ;;  %v550_v34 = vld [vmem:[#allocation7 + $0x260] sm:$0xff] }
  0xf1   : > { %654 = vmatprep.subr.mxu0 %v475_v36  ;;  %762 = vmatpush2.msra.mxu1 %v568_v19  ;;  %v547_v36 = vld [vmem:[#allocation7 + $0x248] sm:$0xff] }
  0xf2   : > { %655 = vmatpush1.msra.mxu0 %v474_v38  ;;  %763 = vmatprep.subr.mxu1 %v565_v21  ;;  %v546_v38 = vld [vmem:[#allocation7 + $0x240] sm:$0xff] }
  0xf3   : > { %656 = vmatprep.subr.mxu0 %v599_v40  ;;  %764 = vmatpush2.msra.mxu1 %v564_v23  ;;  %v543_v40 = vld [vmem:[#allocation7 + $0x228] sm:$0xff]  ;;  %v1593_v23 = vshrl.u32 %v437_v2, 7 }
  0xf4   : > { %657 = vmatpush2.msra.mxu0 %v598_v42  ;;  %765 = vmatprep.subr.mxu1 %v561_v25  ;;  %v542_v42 = vld [vmem:[#allocation7 + $0x220] sm:$0xff] }
  0xf5   : > { %658 = vmatprep.subr.mxu0 %v595_v44  ;;  %766 = vmatpush2.msra.mxu1 %v560_v27  ;;  %v539_v44 = vld [vmem:[#allocation7 + $0x208] sm:$0xff]  ;;  %v443_v27 = vsub.s32 1, %v1593_v23 }
  0xf6   : > { %659 = vmatpush2.msra.mxu0 %v594_v46  ;;  %767 = vmatprep.subr.mxu1 %v557_v29  ;;  %v538_v46 = vld [vmem:[#allocation7 + $0x200] sm:$0xff]  ;;  %v341_v29 = vld [vmem:[%s1727_s2] sm:$0x3] }
  0xf7   : > { %660 = vmatprep.subr.mxu0 %v591_v48  ;;  %768 = vmatpush2.msra.mxu1 %v556_v31 }
  0xf8   : > { %661 = vmatpush2.msra.mxu0 %v590_v50  ;;  %769 = vmatprep.subr.mxu1 %v553_v33 }
  0xf9   : > { %662 = vmatprep.subr.mxu0 %v587_v52  ;;  %770 = vmatpush2.msra.mxu1 %v552_v35  ;;  %v463_v35 = vrot.slane %v341_v29, %v443_v27 }
  0xfa   : > { %663 = vmatpush2.msra.mxu0 %v586_v54  ;;  %771 = vmatprep.subr.mxu1 %v549_v37 }
  0xfb   : > { %664 = vmatprep.subr.mxu0 %v583_v56  ;;  %772 = vmatpush2.msra.mxu1 %v548_v39 }
  0xfc   : > { %665 = vmatpush2.msra.mxu0 %v582_v62  ;;  %773 = vmatprep.subr.mxu1 %v545_v41 }
  0xfd   : > { %666 = vmatprep.subr.mxu0 %v579_v3  ;;  %774 = vmatpush2.msra.mxu1 %v544_v43 }
  0xfe   : > { %667 = vmatpush2.msra.mxu0 %v578_v10  ;;  %775 = vmatprep.subr.mxu1 %v541_v45 }
  0xff   : > { %668 = vmatprep.subr.mxu0 %v575_v1  ;;  %776 = vmatpush2.msra.mxu1 %v540_v47 }
 0x100   : > { %669 = vmatpush2.msra.mxu0 %v574_v12 }
 0x101   : > { %670 = vmatprep.subr.mxu0 %v571_v16 }
 0x102   : > { %671 = vmatpush2.msra.mxu0 %v570_v5 }
 0x103   : > { %672 = vmatprep.subr.mxu0 %v567_v18 }
 0x104   : > { %673 = vmatpush2.msra.mxu0 %v566_v9 }
 0x105   : > { %674 = vmatprep.subr.mxu0 %v563_v20 }
 0x106   : > { %675 = vmatpush2.msra.mxu0 %v562_v22 }
 0x107   : > { %676 = vmatprep.subr.mxu0 %v559_v24 }
 0x108   : > { %677 = vmatpush2.msra.mxu0 %v558_v26  ;;  %v439_v26 = vsub.s32 0, %v1593_v23 }
 0x109   : > { %678 = vmatprep.subr.mxu0 %v555_v28  ;;  %v340_v28 = vld [vmem:[#allocation5] sm:$0x3] }
 0x10a   : > { %679 = vmatpush2.msra.mxu0 %v554_v30  ;;  %v440_v30 = vrot.slane %v340_v28, %v439_v26  ;;  %v444_v31 = vrot.slane %v340_v28, %v443_v27 }
 0x10b   : > { %680 = vmatprep.subr.mxu0 %v551_v32 }
 0x10c   : > { %681 = vmatpush2.msra.mxu0 %v550_v34  ;;  %v459_v34 = vrot.slane %v341_v29, %v439_v26 }
 0x10d   : > { %682 = vmatprep.subr.mxu0 %v547_v36 }
 0x10e   : > { %683 = vmatpush2.msra.mxu0 %v546_v38 }
 0x10f   : > { %684 = vmatprep.subr.mxu0 %v543_v40 }
 0x110   : > { %685 = vmatpush2.msra.mxu0 %v542_v42 }
 0x111   : > { %686 = vmatprep.subr.mxu0 %v539_v44 }
 0x112   : > { %687 = vmatpush2.msra.mxu0 %v538_v46 }
 0x170   : > { %v377_v48 = vpop.xlane.xlu0 %376 }
 0x171   : > { %v388_v49 = vmul.f32 0.003921569, %v377_v48 }
 0x173   : > { %1128 = vrsqrt.f32 %v388_v49  ;;  %vm394_vm0 = vcmp.eq.f32.partialorder %v388_v49, inf  ;;  %v397_v62 = vand.u32 2147483648, %v388_v49  ;;  %vm396_vm1 = vcmp.eq.f32.partialorder %v388_v49, 0.0 }
 0x174   : > { %v380_v50 = vpop.xlane.xlu1 %379  ;;  %v383_v51 = vpop.xlane.xlu0 %382 }
 0x175   : > { %v389_v52 = vmul.f32 0.003921569, %v380_v50  ;;  %v390_v53 = vmul.f32 0.003921569, %v383_v51 }
 0x177   : > { %1130 = vrsqrt.f32 %v389_v52  ;;  %vm401_vm2 = vcmp.eq.f32.partialorder %v389_v52, inf  ;;  %vm403_vm3 = vcmp.eq.f32.partialorder %v389_v52, 0.0  ;;  %v404_v12 = vand.u32 2147483648, %v389_v52 }
 0x178   : > { %1132 = vrsqrt.f32 %v390_v53  ;;  %v386_v54 = vpop.xlane.xlu1 %385  ;;  %vm408_vm4 = vcmp.eq.f32.partialorder %v390_v53, inf  ;;  %v411_v17 = vand.u32 2147483648, %v390_v53  ;;  %vm410_vm5 = vcmp.eq.f32.partialorder %v390_v53, 0.0 }
 0x179   : > { %v391_v55 = vmul.f32 0.003921569, %v386_v54 }
 0x17b   : > { %1134 = vrsqrt.f32 %v391_v55  ;;  %vm415_vm6 = vcmp.eq.f32.partialorder %v391_v55, inf  ;;  %v418_v21 = vand.u32 2147483648, %v391_v55  ;;  %vm417_vm7 = vcmp.eq.f32.partialorder %v391_v55, 0.0 }
 0x180   : > { %v1129_v56 = vpop.eup %1128 }
 0x181   : > { %v393_v57 = vmul.f32 %v1129_v56, %v388_v49  ;;  %v618_v56 = vsub.s32 3, %v1593_v23 }
 0x183   : > { %v395_v63 = vsel %vm394_vm0, %v388_v49, %v393_v57 }
 0x184   : > { %v1131_v3 = vpop.eup %1130  ;;  %v398_v7 = vsel %vm396_vm1, %v397_v62, %v395_v63 }
 0x185   : > { %v1133_v10 = vpop.eup %1132  ;;  %v400_v0 = vmul.f32 %v1131_v3, %v389_v52  ;;  %v420_v1 = vadd.f32 1e-06, %v398_v7 }
 0x186   : > { %v407_v15 = vmul.f32 %v1133_v10, %v390_v53 }
 0x187   : > { %v402_v16 = vsel %vm401_vm2, %v389_v52, %v400_v0  ;;  %1136 = vrcp.f32 %v420_v1 }
 0x188   : > { %v1135_v5 = vpop.eup %1134  ;;  %v405_v6 = vsel %vm403_vm3, %v404_v12, %v402_v16  ;;  %v409_v18 = vsel %vm408_vm4, %v390_v53, %v407_v15 }
 0x189   : > { %v421_v8 = vadd.f32 1e-06, %v405_v6  ;;  %v412_v9 = vsel %vm410_vm5, %v411_v17, %v409_v18  ;;  %v414_v19 = vmul.f32 %v1135_v5, %v391_v55 }
 0x18a   : > { %v422_v20 = vadd.f32 1e-06, %v412_v9 }
 0x18b   : > { %1138 = vrcp.f32 %v421_v8  ;;  %v416_v22 = vsel %vm415_vm6, %v391_v55, %v414_v19 }
 0x18c   : > { %1140 = vrcp.f32 %v422_v20  ;;  %v419_v24 = vsel %vm417_vm7, %v418_v21, %v416_v22 }
 0x18d   : > { %v423_v25 = vadd.f32 1e-06, %v419_v24 }
 0x18f   : > { %1142 = vrcp.f32 %v423_v25 }
 0x194   : > { %v1137_v32 = vpop.eup %1136 }
 0x195   : > { %v426_v33 = vmul.f32 %v1137_v32, %v1557_v59  ;;  %v425_v36 = vmul.f32 %v1137_v32, %v1554_v58 }
 0x197   : > { %v448_v37 = vmul.f32 %v444_v31, %v426_v33  ;;  %v447_v38 = vmul.f32 %v440_v30, %v425_v36 }
 0x198   : > { %v1139_v39 = vpop.eup %1138 }
 0x199   : > { %v1141_v40 = vpop.eup %1140  ;;  %v467_v41 = vadd.f32 %v463_v35, %v448_v37  ;;  %v466_v42 = vadd.f32 %v459_v34, %v447_v38  ;;  %v429_v43 = vmul.f32 %v1139_v39, %v1577_v4  ;;  %v428_v44 = vmul.f32 %v1139_v39, %v1574_v11 }
 0x19a   : > { %v432_v45 = vmul.f32 %v1141_v40, %v1563_v61  ;;  %v431_v46 = vmul.f32 %v1141_v40, %v1560_v60 }
 0x19b   : > { %688 = vmatprep.mubr.f32.mxu0 %v467_v41  ;;  %777 = vmatprep.mubr.f32.mxu1 %v467_v41  ;;  %v450_v59 = vmul.f32 %v444_v31, %v429_v43  ;;  %v449_v47 = vmul.f32 %v440_v30, %v428_v44 }
 0x19c   : > { %v1143_v48 = vpop.eup %1142  ;;  %689 = vmatmul.mubr.f32.vlgmr.msra.gmra.mxu0 %v466_v42  ;;  %778 = vmatmul.mubr.f32.vlgmr.msra.gmra.mxu1 %v466_v42  ;;  %v452_v58 = vmul.f32 %v444_v31, %v432_v45  ;;  %v451_v52 = vmul.f32 %v440_v30, %v431_v46 }
 0x19d   : > { %v469_v49 = vadd.f32 %v463_v35, %v450_v59  ;;  %v468_v50 = vadd.f32 %v459_v34, %v449_v47  ;;  %v435_v51 = vmul.f32 %v1143_v48, %v1583_v14  ;;  %v434_v4 = vmul.f32 %v1143_v48, %v1580_v13  ;;  %v602_v14 = vld [vmem:[%s1729_s4] sm:$0xf] }
 0x19e   : > { %v471_v61 = vadd.f32 %v463_v35, %v452_v58  ;;  %v470_v60 = vadd.f32 %v459_v34, %v451_v52  ;;  %v614_v13 = vsub.s32 2, %v1593_v23  ;;  %v607_v57 = vrot.slane %v602_v14, %v439_v26 }
 0x19f   : > { %694 = vmatprep.mubr.f32.mxu0 %v469_v49  ;;  %783 = vmatprep.mubr.f32.mxu1 %v469_v49  ;;  %v454_v11 = vmul.f32 %v444_v31, %v435_v51  ;;  %v453_v53 = vmul.f32 %v440_v30, %v434_v4  ;;  %v611_v63 = vrot.slane %v602_v14, %v443_v27 }
 0x1a0   : > { %695 = vmatmul.mubr.f32.gmra.mxu0 %v468_v50  ;;  %784 = vmatmul.mubr.f32.gmra.mxu1 %v468_v50  ;;  %v615_v62 = vrot.slane %v602_v14, %v614_v13  ;;  %v619_v3 = vrot.slane %v602_v14, %v618_v56 }
 0x1a1   : > { %700 = vmatprep.mubr.f32.mxu0 %v471_v61  ;;  %789 = vmatprep.mubr.f32.mxu1 %v471_v61  ;;  %v473_v54 = vadd.f32 %v463_v35, %v454_v11  ;;  %v472_v55 = vadd.f32 %v459_v34, %v453_v53 }
 0x1a4   : > { %701 = vmatmul.mubr.f32.gmra.mxu0 %v470_v60  ;;  %790 = vmatmul.mubr.f32.gmra.mxu1 %v470_v60 }
 0x1a5   : > { %706 = vmatprep.mubr.f32.mxu0 %v473_v54  ;;  %795 = vmatprep.mubr.f32.mxu1 %v473_v54 }
 0x1a8   : > { %707 = vmatmul.mubr.f32.gmra.mxu0 %v472_v55  ;;  %796 = vmatmul.mubr.f32.gmra.mxu1 %v472_v55 }
 0x25c   : > { %v690_v7 = vpop.f32.mrf.mxu0  ;;  %v779_v10 = vpop.f32.mrf.mxu1 }
 0x25d   : > { %v691_v0 = vadd.f32 %v690_v7, %v607_v57  ;;  %v780_v1 = vadd.f32 %v779_v10, %v615_v62 }
 0x25e   : > { %v692_v2 = vpop.f32.mrf.mxu0  ;;  %v781_v12 = vpop.f32.mrf.mxu1 }
 0x25f   : > { %802 = vst [vmem:[%s1614_s10] sm:$0xff] %v691_v0  ;;  %806 = vst [vmem:[%s1618_s11] sm:$0xff] %v780_v1  ;;  %v693_v15 = vadd.f32 %v692_v2, %v611_v63  ;;  %v782_v16 = vadd.f32 %v781_v12, %v619_v3 }
 0x260   : > { %v696_v17 = vpop.f32.mrf.mxu0  ;;  %v785_v5 = vpop.f32.mrf.mxu1 }
 0x261   : > { %1015 = vst [vmem:[%s1614_s10 + $0x20] sm:$0xff] %v693_v15  ;;  %1019 = vst [vmem:[%s1618_s11 + $0x20] sm:$0xff] %v782_v16  ;;  %v697_v6 = vadd.f32 %v696_v17, %v607_v57  ;;  %v786_v18 = vadd.f32 %v785_v5, %v615_v62 }
 0x262   : > { %v698_v8 = vpop.f32.mrf.mxu0  ;;  %v787_v9 = vpop.f32.mrf.mxu1 }
 0x263   : > { %803 = vst [vmem:[%s1614_s10 + $0x8] sm:$0xff] %v697_v6  ;;  %807 = vst [vmem:[%s1618_s11 + $0x8] sm:$0xff] %v786_v18  ;;  %v699_v19 = vadd.f32 %v698_v8, %v611_v63  ;;  %v788_v20 = vadd.f32 %v787_v9, %v619_v3 }
 0x264   : > { %v702_v21 = vpop.f32.mrf.mxu0  ;;  %v791_v22 = vpop.f32.mrf.mxu1 }
 0x265   : > { %1016 = vst [vmem:[%s1614_s10 + $0x28] sm:$0xff] %v699_v19  ;;  %1020 = vst [vmem:[%s1618_s11 + $0x28] sm:$0xff] %v788_v20  ;;  %v703_v23 = vadd.f32 %v702_v21, %v607_v57  ;;  %v792_v24 = vadd.f32 %v791_v22, %v615_v62 }
 0x266   : > { %v704_v25 = vpop.f32.mrf.mxu0  ;;  %v793_v26 = vpop.f32.mrf.mxu1 }
 0x267   : > { %804 = vst [vmem:[%s1614_s10 + $0x10] sm:$0xff] %v703_v23  ;;  %808 = vst [vmem:[%s1618_s11 + $0x10] sm:$0xff] %v792_v24  ;;  %v705_v27 = vadd.f32 %v704_v25, %v611_v63  ;;  %v794_v28 = vadd.f32 %v793_v26, %v619_v3 }
 0x268   : > { %v708_v29 = vpop.f32.mrf.mxu0  ;;  %v797_v30 = vpop.f32.mrf.mxu1 }
 0x269   : > { %1017 = vst [vmem:[%s1614_s10 + $0x30] sm:$0xff] %v705_v27  ;;  %1021 = vst [vmem:[%s1618_s11 + $0x30] sm:$0xff] %v794_v28  ;;  %v709_v31 = vadd.f32 %v708_v29, %v607_v57  ;;  %v798_v32 = vadd.f32 %v797_v30, %v615_v62 }
 0x26a   : > { %v710_v33 = vpop.f32.mrf.mxu0  ;;  %v799_v34 = vpop.f32.mrf.mxu1 }
 0x26b   : > { %805 = vst [vmem:[%s1614_s10 + $0x18] sm:$0xff] %v709_v31  ;;  %809 = vst [vmem:[%s1618_s11 + $0x18] sm:$0xff] %v798_v32  ;;  %v711_v35 = vadd.f32 %v710_v33, %v611_v63  ;;  %v800_v36 = vadd.f32 %v799_v34, %v619_v3 }
 0x26d   : > { %1018 = vst [vmem:[%s1614_s10 + $0x38] sm:$0xff] %v711_v35  ;;  %1022 = vst [vmem:[%s1618_s11 + $0x38] sm:$0xff] %v800_v36 }
 0x26e   : > { %1237 = shalt.err (!%p1234_p2)
}
 0x26f   : > { %s1238_s30 = scalar_lea.hbm %s1641_s13, 1024  ;;  %s1242_s11 = scalar_lea.hbm %s1730_s5, 2048 }
 0x270   : > { %p1239_p6 = scmp.ne.s32.totalorder %s1641_s13, %s1238_s30  ;;  %p1243_p0 = scmp.lt.s32.totalorder %s1641_s13, %s1730_s5 }
 0x271   : > { %p1244_p10 = scmp.lt.s32.totalorder %s1242_s11, %s1238_s30 }
 0x272   : > { %p1240_p11 = pnand %p1239_p6, %p1761_p7 }
 0x273   : > { %p1245_p5 = por %p1244_p10, %p1243_p0 }
 0x274   : > { %p1241_p1 = pneg %p1240_p11 }
 0x276   : > { %p1246_p3 = pnand %p1245_p5, %p1241_p1 }
 0x278   : > { %1249 = shalt.err (!%p1246_p3)
}
 0x279   : > { %s1348_s24 = smov 128   ;;  %s1349_s1 = smov 8  }
 0x27a   : > { %1044 = dma.vmem_to_hbm [thread:$0]  (%p1761_p7), %s1632_s14, 1024, %s1641_s13, %s821_s27, %s1348_s24, %s1348_s24, %s1349_s1  }
 0x27b   : > { %s826_s26 = scalar_lea.sflag [#allocation10], %s1514_s20  ;;  %s1250_s17 = scalar_lea.vmem %s1634_s16, 1024 }
 0x27c   : > { %p1251_p8 = scmp.ne.s32.totalorder %s1634_s16, %s1250_s17  ;;  %s1350_s28 = smov [#allocation9]  }
 0x27d   : > { %s1254_s21 = sshll.u32 %s1350_s28, 4  ;;  %s1255_s21 = int_to_ptr.vmem [resolvable:$false] %s1254_s21 }
 0x27e   : > { %p1252_p9 = pnand %p1251_p8, %p1761_p7  ;;  %s1256_s29 = scalar_lea.vmem %s1255_s21, 2048 }
 0x27f   : > { %p1257_p13 = scmp.lt.s32.totalorder %s1634_s16, %s1255_s21  ;;  %p1258_p4 = scmp.lt.s32.totalorder %s1256_s29, %s1250_s17 }
 0x280   : > { %p1253_p12 = pneg %p1252_p9 }
 0x281   : > { %p1259_p2 = por %p1258_p4, %p1257_p13 }
 0x283   : > { %p1260_p6 = pnand %p1259_p2, %p1253_p12 }
 0x285   : > { %1263 = shalt.err (!%p1260_p6)
}
 0x286   : > { %s1264_s14 = scalar_lea.hbm %s1648_s15, 1024  ;;  %s1268_s27 = scalar_lea.hbm %s1731_s6, 2048 }
 0x287   : > { %p1265_p11 = scmp.ne.s32.totalorder %s1648_s15, %s1264_s14  ;;  %p1269_p10 = scmp.lt.s32.totalorder %s1648_s15, %s1731_s6 }
 0x288   : > { %p1270_p5 = scmp.lt.s32.totalorder %s1268_s27, %s1264_s14 }
 0x289   : > { %p1266_p1 = pnand %p1265_p11, %p1761_p7 }
 0x28a   : > { %p1271_p3 = por %p1270_p5, %p1269_p10 }
 0x28b   : > { %p1267_p0 = pneg %p1266_p1 }
 0x28d   : > { %p1272_p8 = pnand %p1271_p3, %p1267_p0 }
 0x28f   : > { %1275 = shalt.err (!%p1272_p8)
}
 0x290   : > { %1045 = dma.vmem_to_hbm [thread:$0]  (%p1761_p7), %s1634_s16, 1024, %s1648_s15, %s826_s26, %s1348_s24, %s1348_s24, %s1349_s1  }
 0x291 PF: > { %s1762_s10 = sld [smem:[#allocation15_spill]] }
 0x292   : > { %s1763_s11 = sld [smem:[#allocation17_spill]] }
 0x293   : > { %s1764_s7 = sld [smem:[#allocation16_spill]] }
 0x297   : > { %s874_s12 = sand.u32 1, %s1762_s10  }
 0x298   : > { %p1765_p9 = scmp.ne.s32.totalorder %s1763_s11, 0  ;;  %s875_s17 = scalar_lea.sflag [#allocation4], %s874_s12 }
 0x299   : > { %p1766_p12 = scmp.ge.s32.totalorder %s1764_s7, 2 }
 0x29b   : > { %p1060_p13 = pnand %p1766_p12, %p1765_p9 }
 0x29d   : > { %p1061_p4 = pneg %p1060_p13 }
 0x29f   : > { %1309 = dma.done.wait (%p1061_p4), %s875_s17, 1024  }
 0x2a0   : > { %1311 = vsyncadd (%p1061_p4), %s875_s17, 4294966272  ;;  %s884_s28 = scalar_lea.sflag [#allocation10], %s874_s12 }
 0x2a1   : > { %1313 = dma.done.wait (%p1061_p4), %s884_s28, 1024  }
 0x2a2   : > { %1315 = vsyncadd (%p1061_p4), %s884_s28, 4294966272  ;;  %s27_s26 = sadd.s32 1, %s1764_s7   ;;  %s1767_s21 = smov %s1322_s22 }
 0x2a3   : > { %p24_p2 = scmp.ge.s32.totalorder %s27_s26, 4   ;;  %s1768_s22 = smov %s1326_s23 }
 0x2a4   : > { %s1769_s23 = smov %s1509_s19  ;;  %s1770_s24 = smov %s1334_s25 }
 0x2a5   : > { %s1771_s25 = smov %s1773_s18  ;;  %26 = sbr.rel (!%p24_p2) target bundleno = 11 (0xb), region = 112 }
 0x2aa   :  { %889 = vsyncpa [#allocation3], 1 }
 0x2ab   :  { %891 = vsyncpa [#allocation3 + $0x1], 1 }
 0x2ac   :  { %892 = vsyncpa [#allocation6], 1 }
 0x2ad   :  { %893 = vsyncpa [#allocation4], 1 }
 0x2ae   :  { %895 = vsyncpa [#allocation4 + $0x1], 1 }
 0x2af   :  { %896 = vsyncpa [#allocation10], 1 }
 0x2b0   :  { %898 = vsyncpa [#allocation10 + $0x1], 1 }

</bundles_post_ra>
